<compile_context>
chip_gen: v6e
topology: v6e:2x2x1
jax: 0.10.0
libtpu: 0.0.40
codegen_flags: <defaults>
</compile_context>

<pallas_src>
import functools

import jax
import jax.numpy as jnp
from jax.experimental import pallas as pl
from jax.experimental.pallas import tpu as pltpu


def cde_func_kernel(zT_ref, w1T_ref, b1_ref, w2T_ref, b2_ref, oT_ref):
    # zT_ref:  (D, bb)        batch tile, batch on the lane axis
    # w1T_ref: (Hp, D)        first linear weight, transposed, hidden padded to 128
    # b1_ref:  (Hp, 1)        f32
    # w2T_ref: (DD, Hp)       second linear weight, transposed
    # b2_ref:  (DD, 1)        f32
    # oT_ref:  (DD, bb)       lane-dense output tile
    zT = zT_ref[...]
    hT = jnp.dot(w1T_ref[...], zT, preferred_element_type=jnp.float32) + b1_ref[...]
    hT = jnp.tanh(hT)                                   # EUP, (Hp, bb) lane-dense
    hT = hT.astype(w2T_ref.dtype)                       # bf16 path feeds MXU natively
    outT = jnp.dot(w2T_ref[...], hT, preferred_element_type=jnp.float32) + b2_ref[...]
    oT_ref[...] = outT.astype(oT_ref.dtype)


def _pick_block_b(B):
    # Small / ragged batches: one full-array tile (full dims are always legal).
    if B % 128 != 0:
        return B
    # Prefer a 128..1024-wide lane tile that leaves >=2 grid steps so the
    # pipeline (and v7x dual-core sharding) actually has work to overlap.
    for cand in (1024, 512, 256, 128):
        if B % cand == 0 and (B // cand >= 2 or cand == 128):
            return cand
    return B


def cde_func_forward(t, z, w1, b1, w2, b2, *, block_b=None,
                     param_dtype=jnp.float32):
    """Pallas implementation of CDEFunc.forward(t, z).

    t is unused (matches the PyTorch module).
    z:  (B, D) float32
    w1: (D, H), b1: (H,), w2: (H, D*D), b2: (D*D,)   (weights stored as (in, out))
    param_dtype: jnp.float32 or jnp.bfloat16 (bf16 halves z/weight HBM traffic;
                 accumulation stays f32).
    returns (B, D, D) float32
    """
    del t
    B, D = z.shape
    H = w1.shape[1]
    DD = w2.shape[1]
    assert DD == D * D

    # --- Exact zero-padding of the hidden width to a multiple of 128 ---------
    H_pad = max(128, ((H + 127) // 128) * 128)
    pad = H_pad - H
    w1_p = jnp.pad(w1, ((0, 0), (0, pad)))       # (D, Hp)
    b1_p = jnp.pad(b1, ((0, pad),))              # (Hp,)   tanh(0)=0
    w2_p = jnp.pad(w2, ((0, pad), (0, 0)))       # (Hp, DD) padded rows are zero

    # --- Batch-on-lanes layout (lane-dense output) ---------------------------
    zT = z.T.astype(param_dtype)                 # (D, B)
    w1T = w1_p.T.astype(param_dtype)             # (Hp, D)
    w2T = w2_p.T.astype(param_dtype)             # (DD, Hp)
    b1c = b1_p.reshape(H_pad, 1).astype(jnp.float32)
    b2c = b2.reshape(DD, 1).astype(jnp.float32)

    if block_b is None:
        block_b = _pick_block_b(B)
    assert B % block_b == 0
    grid = (B // block_b,)

    itemsize = jnp.dtype(param_dtype).itemsize
    cost = pl.CostEstimate(
        flops=2 * B * (D * H_pad + H_pad * DD),
        transcendentals=B * H_pad,
        bytes_accessed=(B * D * itemsize                 # z read
                        + (H_pad * D + DD * H_pad) * itemsize  # weights
                        + (H_pad + DD) * 4                     # biases
                        + B * DD * 4),                         # output write
    )

    outT = pl.pallas_call(
        cde_func_kernel,
        out_shape=jax.ShapeDtypeStruct((DD, B), jnp.float32),
        grid_spec=pltpu.PrefetchScalarGridSpec(
            num_scalar_prefetch=0,
            grid=grid,
            in_specs=[
                pl.BlockSpec((D, block_b), lambda i: (0, i)),     # z^T: tiled over batch (lanes)
                pl.BlockSpec((H_pad, D), lambda i: (0, 0)),       # w1^T: resident
                pl.BlockSpec((H_pad, 1), lambda i: (0, 0)),       # b1
                pl.BlockSpec((DD, H_pad), lambda i: (0, 0)),      # w2^T: resident
                pl.BlockSpec((DD, 1), lambda i: (0, 0)),          # b2
            ],
            out_specs=pl.BlockSpec((DD, block_b), lambda i: (0, i)),
        ),
        compiler_params=pltpu.CompilerParams(
            dimension_semantics=("parallel",),   # batch axis: megacore-shardable on v7x
        ),
        cost_estimate=cost,
    )(zT, w1T, b1c, w2T, b2c)

    # Un-transpose in the wrapper (layout plumbing, not compute).
    # Matches torch: .view(z.size(0), z.size(1), -1)  -> (B, D, D)
    return outT.T.reshape(B, D, D)


def _reference(z, w1, b1, w2, b2):
    h = jnp.tanh(z @ w1 + b1)
    out = h @ w2 + b2
    return out.reshape(z.shape[0], z.shape[1], -1)


if __name__ == "__main__":
    key = jax.random.PRNGKey(0)
    B = 256         # batch (multiple of 128 -> lane-dense tiles, grid=(2,))
    D = 4           # input_dim
    H = 100         # hidden width from the module

    k_z, k_w1, k_b1, k_w2, k_b2 = jax.random.split(key, 5)
    z = jax.random.normal(k_z, (B, D), dtype=jnp.float32)
    # Deterministic synthetic parameters (shapes match nn.Linear(D,100), nn.Linear(100,D*D)).
    w1 = jax.random.normal(k_w1, (D, H), dtype=jnp.float32) * 0.1
    b1 = jax.random.normal(k_b1, (H,), dtype=jnp.float32) * 0.1
    w2 = jax.random.normal(k_w2, (H, D * D), dtype=jnp.float32) * 0.1
    b2 = jax.random.normal(k_b2, (D * D,), dtype=jnp.float32) * 0.1

    t = jnp.float32(0.0)  # unused, kept for signature parity

    ref = _reference(z, w1, b1, w2, b2)

    # f32 path (exact vs reference).
    out = cde_func_forward(t, z, w1, b1, w2, b2)
    out = jax.block_until_ready(out)
    assert out.shape == (B, D, D), out.shape
    assert jnp.allclose(out, ref, atol=1e-4, rtol=1e-4), "f32 mismatch vs reference"

    # bf16 weight/activation path (v6e/v7x bandwidth optimization), f32 accumulation.
    out_bf16 = cde_func_forward(t, z, w1, b1, w2, b2, param_dtype=jnp.bfloat16)
    out_bf16 = jax.block_until_ready(out_bf16)
    assert out_bf16.shape == (B, D, D), out_bf16.shape
    assert float(jnp.max(jnp.abs(out_bf16 - ref))) < 1e-1, "bf16 path diverged"

    print("KERNEL_OK")
</pallas_src>

<mosaic_0001>
module attributes {stable_mosaic.version = 11 : i64} {
  func.func @cde_func_kernel(%arg0: i32, %arg1: memref<4x128xf32, #tpu.memory_space<vmem>>, %arg2: memref<128x4xf32, #tpu.memory_space<vmem>>, %arg3: memref<128x1xf32, #tpu.memory_space<vmem>>, %arg4: memref<16x128xf32, #tpu.memory_space<vmem>>, %arg5: memref<16x1xf32, #tpu.memory_space<vmem>>, %arg6: memref<16x128xf32, #tpu.memory_space<vmem>>) attributes {dimension_semantics = [#tpu.dimension_semantics<parallel>], iteration_bounds = array<i64: 2>, scalar_prefetch = 0 : i64, scratch_operands = 0 : i64, tpu.core_type = #tpu.core_type<tc>, window_params = [{transform_indices = @transform_0, window_bounds = array<i64: 4, 128>}, {pipeline_mode = #tpu.pipeline_mode<synchronous>, transform_indices = @transform_1, window_bounds = array<i64: 128, 4>}, {pipeline_mode = #tpu.pipeline_mode<synchronous>, transform_indices = @transform_2, window_bounds = array<i64: 128, 1>}, {pipeline_mode = #tpu.pipeline_mode<synchronous>, transform_indices = @transform_3, window_bounds = array<i64: 16, 128>}, {pipeline_mode = #tpu.pipeline_mode<synchronous>, transform_indices = @transform_4, window_bounds = array<i64: 16, 1>}, {transform_indices = @transform_5, window_bounds = array<i64: 16, 128>}]} {
    %c0 = arith.constant 0 : index
    %c0_0 = arith.constant 0 : index
    %0 = vector.load %arg1[%c0, %c0_0] : memref<4x128xf32, #tpu.memory_space<vmem>>, vector<4x128xf32>
    %c0_1 = arith.constant 0 : index
    %c0_2 = arith.constant 0 : index
    %1 = vector.load %arg2[%c0_1, %c0_2] : memref<128x4xf32, #tpu.memory_space<vmem>>, vector<128x4xf32>
    %cst = arith.constant dense<0.000000e+00> : vector<128x128xf32>
    %2 = tpu.matmul %1, %0, %cst {dimension_numbers = #tpu.dot_dimension_numbers<[1], [0], [0], [1], [0, 0, 1, 1], [], []>} : vector<128x4xf32>, vector<4x128xf32>, vector<128x128xf32> -> vector<128x128xf32>
    %c0_3 = arith.constant 0 : index
    %c0_4 = arith.constant 0 : index
    %3 = vector.load %arg3[%c0_3, %c0_4] : memref<128x1xf32, #tpu.memory_space<vmem>>, vector<128x1xf32>
    %4 = vector.broadcast %3 : vector<128x1xf32> to vector<128x128xf32>
    %5 = arith.addf %2, %4 : vector<128x128xf32>
    %6 = math.tanh %5 : vector<128x128xf32>
    %c0_5 = arith.constant 0 : index
    %c0_6 = arith.constant 0 : index
    %7 = vector.load %arg4[%c0_5, %c0_6] : memref<16x128xf32, #tpu.memory_space<vmem>>, vector<16x128xf32>
    %cst_7 = arith.constant dense<0.000000e+00> : vector<16x128xf32>
    %8 = tpu.matmul %7, %6, %cst_7 {dimension_numbers = #tpu.dot_dimension_numbers<[1], [0], [0], [1], [0, 0, 1, 1], [], []>} : vector<16x128xf32>, vector<128x128xf32>, vector<16x128xf32> -> vector<16x128xf32>
    %c0_8 = arith.constant 0 : index
    %c0_9 = arith.constant 0 : index
    %9 = vector.load %arg5[%c0_8, %c0_9] : memref<16x1xf32, #tpu.memory_space<vmem>>, vector<16x1xf32>
    %10 = vector.broadcast %9 : vector<16x1xf32> to vector<16x128xf32>
    %11 = arith.addf %8, %10 : vector<16x128xf32>
    %c0_10 = arith.constant 0 : index
    %c0_11 = arith.constant 0 : index
    %12 = vector.load %arg6[%c0_10, %c0_11] : memref<16x128xf32, #tpu.memory_space<vmem>>, vector<16x128xf32>
    tpu.vector_store %arg6[%c0_10, %c0_11], %11 {strides = array<i32>} : memref<16x128xf32, #tpu.memory_space<vmem>>, vector<16x128xf32>,
    return
  }
  func.func @transform_0(%arg0: i32) -> (i32, i32) {
    %c0_i32 = arith.constant 0 : i32
    %c0_i32_0 = arith.constant 0 : i32
    return %c0_i32, %arg0 : i32, i32
  }
  func.func @transform_1(%arg0: i32) -> (i32, i32) {
    %c0_i32 = arith.constant 0 : i32
    %c0_i32_0 = arith.constant 0 : i32
    %c0_i32_1 = arith.constant 0 : i32
    return %c0_i32, %c0_i32_0 : i32, i32
  }
  func.func @transform_2(%arg0: i32) -> (i32, i32) {
    %c0_i32 = arith.constant 0 : i32
    %c0_i32_0 = arith.constant 0 : i32
    %c0_i32_1 = arith.constant 0 : i32
    return %c0_i32, %c0_i32_0 : i32, i32
  }
  func.func @transform_3(%arg0: i32) -> (i32, i32) {
    %c0_i32 = arith.constant 0 : i32
    %c0_i32_0 = arith.constant 0 : i32
    %c0_i32_1 = arith.constant 0 : i32
    return %c0_i32, %c0_i32_0 : i32, i32
  }
  func.func @transform_4(%arg0: i32) -> (i32, i32) {
    %c0_i32 = arith.constant 0 : i32
    %c0_i32_0 = arith.constant 0 : i32
    %c0_i32_1 = arith.constant 0 : i32
    return %c0_i32, %c0_i32_0 : i32, i32
  }
  func.func @transform_5(%arg0: i32) -> (i32, i32) {
    %c0_i32 = arith.constant 0 : i32
    %c0_i32_0 = arith.constant 0 : i32
    return %c0_i32, %arg0 : i32, i32
  }
}

</mosaic_0001>

<bundles_post_ra>
// kernel: tpu_custom_call.1
= control target key start
LH: loop header
LB: loop body
LE: loop exit
PB: predicated region body
PF: predicated region fallthrough
CT: control target
= control target key end

     0   :  { %10 = vsyncpa [#allocation3], 0  ;;  %s1245_s0 = inlined_call_operand.vmem [shape: f32[4,256], index: 0, kind: input, shape index: {}]   ;;  %s1246_s1 = inlined_call_operand.vmem [shape: f32[128,4], index: 1, kind: input, shape index: {}]   ;;  %s1247_s2 = inlined_call_operand.vmem [shape: f32[128,1], index: 2, kind: input, shape index: {}]   ;;  %s1248_s3 = inlined_call_operand.vmem [shape: f32[16,128], index: 3, kind: input, shape index: {}]   ;;  %s1249_s4 = inlined_call_operand.vmem [shape: f32[16,1], index: 4, kind: input, shape index: {}]   ;;  %s1250_s5 = inlined_call_operand.hbm [shape: f32[16,256], index: 5, kind: output, shape index: {}]  }
   0x1   :  { %12 = vsyncpa [#allocation3 + $0x1], 0  ;;  %s1010_s18 = smov 0   ;;  %s1012_s19 = smov 0  }
   0x2   :  { %s1014_s20 = smov 0   ;;  %s1016_s21 = smov 0  }
   0x3 LB: > { %s1031_s22 = sadd.s32 4294967295, %s973_s21   ;;  %s713_s23 = sadd.s32 4294967294, %s973_s21   ;;  %s973_s21 = sphi %s1016_s21, %s1256_s21   ;;  %s969_s20 = sphi %s1014_s20, %s1255_s20   ;;  %s965_s19 = sphi %s1012_s19, %s1254_s19   ;;  %s961_s18 = sphi %s1010_s18, %s1253_s18  }
   0x4   : > { %s1035_s24 = sadd.s32 1, %s973_s21   ;;  %s135_s25 = sadd.s32 1, %s969_s20 }
   0x5   : > { %s132_s26 = ssub.s32 %s973_s21, %s1035_s24  ;;  %p145_p0 = scmp.ne.s32.totalorder %s969_s20, %s965_s19 }
   0x6   : > { %p133_p1 = scmp.eq.s32.totalorder %s132_s26, 0  ;;  %p146_p2 = scmp.eq.s32.totalorder %s1031_s22, 1 }
   0x7   : > { %p151_p3 = scmp.ne.s32.totalorder %s965_s19, %s961_s18  ;;  %p152_p4 = scmp.eq.s32.totalorder %s713_s23, 1 }
   0x8   : > { %s1046_s27 = scalar_select %p133_p1, %s969_s20, %s135_s25  }
   0x9   : > { %p1048_p5 = por %p146_p2, %p145_p0  ;;  %p1052_p6 = por %p152_p4, %p151_p3 }
   0xa   : > { %p716_p7 = scmp.ge.s32.totalorder %s973_s21, 1  ;;  %p189_p8 = scmp.lt.s32.totalorder %s973_s21, 3 }
   0xc   : > { %p190_p9 = pnand %p716_p7, %p189_p8 }
   0xd   : > { %p216_p10 = scmp.lt.s32.totalorder (!%p190_p9), %s1031_s22, 1  ;;  %s213_s23 = sand.u32 (!%p190_p9), 1, %s965_s19  }
   0xe   : > { %193 = sbr.rel (%p190_p9) target bundleno = 507 (0x1fb), region = 40  ;;  %s717_s25 = sshll.u32 (!%p190_p9), %s213_s23, 4 }
   0xf   : > { %s215_s26 = scalar_lea.vmem (!%p190_p9), [#allocation2], %s717_s25  ;;  %s737_s6 = sshll.u32 (!%p190_p9), %s1031_s22, 7 }
  0x10   : > { %s651_s30 = sshll.u32 (!%p190_p9), %s215_s26, 4  ;;  %s1203_s9 = scalar_lea.hbm (!%p190_p9), %s1250_s5, %s737_s6  ;;  %s1198_s30 = int_to_ptr.vmem [resolvable:$true] %s651_s30 }
  0x11   : > { %s1205_s10 = scalar_lea.sflag (!%p190_p9), [#allocation3], %s213_s23 }
  0x13   : > { %v221_v0 = vld [vmem:[%s1246_s1] sm:$0xff]  ;;  %vm333_vm0 = vcmask 31744   ;;  %s217_s7 = scalar_select %p216_p10, %s1031_s22, 1  ;;  %v975_v1 = vmov 0   ;;  %vm382_vm1 = vcmask 1043456   ;;  %v252_v2 = vld [vmem:[%s1247_s2 + $0x78] sm:$0xff] }
  0x14   : > { %777 = vmatprep.mubr.msk.f32.mxu0 %vm333_vm0, %v221_v0  ;;  %879 = vset.pattern.permute.xlu0 %v975_v1  ;;  %v250_v3 = vld [vmem:[%s1247_s2 + $0x68] sm:$0xff]  ;;  %v223_v6 = vld [vmem:[%s1246_s1 + $0x10] sm:$0xff]  ;;  %v249_v8 = vld [vmem:[%s1247_s2 + $0x60] sm:$0xff]  ;;  %s913_s22 = scalar_lea.vmem %s1198_s30, 256 }
  0x15   : > { %880 = vset.pattern.permute.xlu1 %v975_v1  ;;  %s718_s8 = sshll.u32 %s217_s7, 2  ;;  %v222_v5 = vld [vmem:[%s1246_s1 + $0x8] sm:$0xff]  ;;  %330 = vperm.xlu0 %879, %v252_v2   ;;  %v251_v7 = vld [vmem:[%s1247_s2 + $0x70] sm:$0xff]  ;;  %v224_v9 = vld [vmem:[%s1246_s1 + $0x18] sm:$0xff]  ;;  %p914_p11 = scmp.ne.s32.totalorder %s1198_s30, %s913_s22 }
  0x16   : > { %s219_s11 = scalar_lea.vmem %s1245_s0, %s718_s8  ;;  %320 = vperm.xlu1 %880, %v250_v3   ;;  %v225_v10 = vld [vmem:[%s1246_s1 + $0x20] sm:$0xff]  ;;  %v248_v11 = vld [vmem:[%s1247_s2 + $0x58] sm:$0xff]  ;;  %v247_v12 = vld [vmem:[%s1247_s2 + $0x50] sm:$0xff] }
  0x17   : > { %v220_v4 = vld [vmem:[%s219_s11] sm:$0xf]  ;;  %v226_v13 = vld [vmem:[%s1246_s1 + $0x28] sm:$0xff]  ;;  %v227_v14 = vld [vmem:[%s1246_s1 + $0x30] sm:$0xff]  ;;  %p915_p12 = pnand %p914_p11, %p1048_p5  ;;  %s976_s11 = smov [#allocation2]  }
  0x18   : > { %775 = vmatprep.subr.msk.mxu0 %vm382_vm1, %v220_v4  ;;  %v246_v15 = vld [vmem:[%s1247_s2 + $0x48] sm:$0xff]  ;;  %v245_v16 = vld [vmem:[%s1247_s2 + $0x40] sm:$0xff]  ;;  %v228_v17 = vld [vmem:[%s1246_s1 + $0x38] sm:$0xff]  ;;  %s917_s12 = sshll.u32 %s976_s11, 4  ;;  %s918_s12 = int_to_ptr.vmem [resolvable:$false] %s917_s12 }
  0x19   : > { %776 = vmatpush3.msk.msra.mxu0 %vm382_vm1, %v220_v4  ;;  %325 = vperm.xlu0 %879, %v251_v7   ;;  %v229_v18 = vld [vmem:[%s1246_s1 + $0x40] sm:$0xff]  ;;  %v244_v19 = vld [vmem:[%s1247_s2 + $0x38] sm:$0xff]  ;;  %v243_v20 = vld [vmem:[%s1247_s2 + $0x30] sm:$0xff]  ;;  %p916_p13 = pneg %p915_p12  ;;  %s919_s13 = scalar_lea.vmem %s918_s12, 512 }
  0x1a   : > { %778 = vmatmul.mubr.msk.f32.vlgmr.msra.gmra.mxu0 %vm333_vm0, %v222_v5  ;;  %315 = vperm.xlu1 %880, %v249_v8   ;;  %v230_v21 = vld [vmem:[%s1246_s1 + $0x48] sm:$0xff]  ;;  %v231_v22 = vld [vmem:[%s1246_s1 + $0x50] sm:$0xff]  ;;  %v241_v24 = vld [vmem:[%s1247_s2 + $0x20] sm:$0xff]  ;;  %p920_p0 = scmp.lt.s32.totalorder %s1198_s30, %s918_s12  ;;  %p921_p1 = scmp.lt.s32.totalorder %s919_s13, %s913_s22 }
  0x1b   : > { %780 = vmatprep.mubr.msk.f32.mxu0 %vm333_vm0, %v223_v6  ;;  %v242_v23 = vld [vmem:[%s1247_s2 + $0x28] sm:$0xff]  ;;  %v232_v25 = vld [vmem:[%s1246_s1 + $0x58] sm:$0xff]  ;;  %v233_v26 = vld [vmem:[%s1246_s1 + $0x60] sm:$0xff] }
  0x1c   : > { %v240_v27 = vld [vmem:[%s1247_s2 + $0x18] sm:$0xff]  ;;  %v239_v28 = vld [vmem:[%s1247_s2 + $0x10] sm:$0xff]  ;;  %v234_v29 = vld [vmem:[%s1246_s1 + $0x68] sm:$0xff]  ;;  %p922_p2 = por %p921_p1, %p920_p0 }
  0x1d   : > { %310 = vperm.xlu0 %879, %v248_v11   ;;  %v235_v30 = vld [vmem:[%s1246_s1 + $0x70] sm:$0xff]  ;;  %v238_v31 = vld [vmem:[%s1247_s2 + $0x8] sm:$0xff]  ;;  %v237_v32 = vld [vmem:[%s1247_s2] sm:$0xff] }
  0x1e   : > { %781 = vmatmul.mubr.msk.f32.gmra.mxu0 %vm333_vm0, %v224_v9  ;;  %305 = vperm.xlu1 %880, %v247_v12   ;;  %v236_v33 = vld [vmem:[%s1246_s1 + $0x78] sm:$0xff]  ;;  %v549_v34 = vld [vmem:[%s1249_s4] sm:$0xff]  ;;  %v550_v35 = vld [vmem:[%s1249_s4 + $0x8] sm:$0xff]  ;;  %p923_p3 = pnand %p922_p2, %p916_p13 }
  0x1f   : > { %783 = vmatprep.mubr.msk.f32.mxu0 %vm333_vm0, %v225_v10  ;;  %v547_v36 = vld [vmem:[%s1248_s3] sm:$0xff] }
  0x20   : > { %833 = vmatprep.mubr.f32.mxu1 %v547_v36 }
  0x21   : > { %300 = vperm.xlu0 %879, %v246_v15  }
  0x22   : > { %784 = vmatmul.mubr.msk.f32.gmra.mxu0 %vm333_vm0, %v226_v13  ;;  %295 = vperm.xlu1 %880, %v245_v16  }
  0x23   : > { %786 = vmatprep.mubr.msk.f32.mxu0 %vm333_vm0, %v227_v14 }
  0x25   : > { %290 = vperm.xlu0 %879, %v244_v19  }
  0x26   : > { %787 = vmatmul.mubr.msk.f32.gmra.mxu0 %vm333_vm0, %v228_v17  ;;  %285 = vperm.xlu1 %880, %v243_v20  }
  0x27   : > { %789 = vmatprep.mubr.msk.f32.mxu0 %vm333_vm0, %v229_v18 }
  0x29   : > { %280 = vperm.xlu0 %879, %v242_v23  }
  0x2a   : > { %790 = vmatmul.mubr.msk.f32.gmra.mxu0 %vm333_vm0, %v230_v21  ;;  %275 = vperm.xlu1 %880, %v241_v24  }
  0x2b   : > { %792 = vmatprep.mubr.msk.f32.mxu0 %vm333_vm0, %v231_v22 }
  0x2d   : > { %270 = vperm.xlu0 %879, %v240_v27  }
  0x2e   : > { %793 = vmatmul.mubr.msk.f32.gmra.mxu0 %vm333_vm0, %v232_v25  ;;  %265 = vperm.xlu1 %880, %v239_v28  }
  0x2f   : > { %795 = vmatprep.mubr.msk.f32.mxu0 %vm333_vm0, %v233_v26 }
  0x31   : > { %260 = vperm.xlu0 %879, %v238_v31  }
  0x32   : > { %796 = vmatmul.mubr.msk.f32.gmra.mxu0 %vm333_vm0, %v234_v29  ;;  %255 = vperm.xlu1 %880, %v237_v32  }
  0x33   : > { %798 = vmatprep.mubr.msk.f32.mxu0 %vm333_vm0, %v235_v30 }
  0x35   : > { %553 = vperm.xlu0 %879, %v549_v34  }
  0x36   : > { %799 = vmatmul.mubr.msk.f32.gmra.mxu0 %vm333_vm0, %v236_v33  ;;  %558 = vperm.xlu1 %880, %v550_v35  }
  0x90   : > { %v331_v42 = vpop.permute.xlu0 %330 }
  0x91   : > { %v321_v44 = vpop.permute.xlu1 %320 }
  0x94   : > { %v326_v47 = vpop.permute.xlu0 %325 }
  0x95   : > { %v316_v49 = vpop.permute.xlu1 %315 }
  0x98   : > { %v311_v52 = vpop.permute.xlu0 %310 }
  0x99   : > { %v306_v54 = vpop.permute.xlu1 %305 }
  0x9c   : > { %v301_v57 = vpop.permute.xlu0 %300 }
  0x9d   : > { %v296_v60 = vpop.permute.xlu1 %295 }
  0xa0   : > { %v291_v1 = vpop.permute.xlu0 %290 }
  0xa1   : > { %v286_v3 = vpop.permute.xlu1 %285 }
  0xa4   : > { %v281_v6 = vpop.permute.xlu0 %280 }
  0xa5   : > { %v276_v8 = vpop.permute.xlu1 %275 }
  0xa8   : > { %v271_v13 = vpop.permute.xlu0 %270 }
  0xa9   : > { %v266_v16 = vpop.permute.xlu1 %265 }
  0xac   : > { %v261_v21 = vpop.permute.xlu0 %260 }
  0xad   : > { %v256_v24 = vpop.permute.xlu1 %255 }
  0xda   : > { %v1184_v37 = vpop.f32.mrf.mxu0 }
  0xdb   : > { %v458_v25 = vadd.f32 %v1184_v37, %v261_v21  ;;  %v548_v37 = vld [vmem:[%s1248_s3 + $0x8] sm:$0xff] }
  0xdc   : > { %v1186_v38 = vpop.f32.mrf.mxu0 }
  0xdd   : > { %v453_v27 = vadd.f32 %v1186_v38, %v256_v24  ;;  %v559_v38 = vpop.permute.xlu1 %558 }
  0xde   : > { %v782_v39 = vpop.f32.mrf.mxu0 }
  0xdf   : > { %v468_v19 = vadd.f32 %v782_v39, %v271_v13 }
  0xe0   : > { %v1188_v40 = vpop.f32.mrf.mxu0 }
  0xe1   : > { %v463_v22 = vadd.f32 %v1188_v40, %v266_v16 }
  0xe2   : > { %v785_v41 = vpop.f32.mrf.mxu0 }
  0xe3   : > { %v478_v14 = vadd.f32 %v785_v41, %v281_v6  ;;  %v554_v41 = vpop.permute.xlu0 %553 }
  0xe4   : > { %v472_v43 = vpop.f32.mrf.mxu0 }
  0xe5   : > { %v473_v17 = vadd.f32 %v472_v43, %v276_v8 }
  0xe6   : > { %v788_v45 = vpop.f32.mrf.mxu0 }
  0xe7   : > { %v488_v9 = vadd.f32 %v788_v45, %v291_v1 }
  0xe8   : > { %v482_v46 = vpop.f32.mrf.mxu0 }
  0xe9   : > { %v483_v11 = vadd.f32 %v482_v46, %v286_v3 }
  0xea   : > { %v791_v48 = vpop.f32.mrf.mxu0 }
  0xeb   : > { %v498_v5 = vadd.f32 %v791_v48, %v301_v57 }
  0xec   : > { %v492_v50 = vpop.f32.mrf.mxu0 }
  0xed   : > { %v493_v7 = vadd.f32 %v492_v50, %v296_v60 }
  0xee   : > { %v794_v51 = vpop.f32.mrf.mxu0 }
  0xef   : > { %v508_v2 = vadd.f32 %v794_v51, %v311_v52 }
  0xf0   : > { %v502_v53 = vpop.f32.mrf.mxu0 }
  0xf1   : > { %v503_v4 = vadd.f32 %v502_v53, %v306_v54 }
  0xf2   : > { %v797_v55 = vpop.f32.mrf.mxu0 }
  0xf3   : > { %v518_v62 = vadd.f32 %v797_v55, %v321_v44 }
  0xf4   : > { %v512_v56 = vpop.f32.mrf.mxu0 }
  0xf5   : > { %v513_v0 = vadd.f32 %v512_v56, %v316_v49 }
  0xf6   : > { %v800_v58 = vpop.f32.mrf.mxu0 }
  0xf7   : > { %v528_v59 = vadd.f32 %v800_v58, %v331_v42 }
  0xf8   : > { %v522_v61 = vpop.f32.mrf.mxu0 }
  0xf9   : > { %881 = vtanh.f32 %v528_v59  ;;  %v523_v63 = vadd.f32 %v522_v61, %v326_v47 }
  0xfb   : > { %883 = vtanh.f32 %v523_v63 }
  0xfc   : > { %885 = vtanh.f32 %v518_v62 }
  0xfd   : > { %887 = vtanh.f32 %v513_v0 }
  0xfe   : > { %889 = vtanh.f32 %v508_v2 }
  0xff   : > { %891 = vtanh.f32 %v503_v4 }
 0x100   : > { %893 = vtanh.f32 %v498_v5 }
 0x101   : > { %895 = vtanh.f32 %v493_v7 }
 0x102   : > { %897 = vtanh.f32 %v488_v9 }
 0x103   : > { %899 = vtanh.f32 %v483_v11 }
 0x104   : > { %901 = vtanh.f32 %v478_v14 }
 0x105   : > { %903 = vtanh.f32 %v473_v17 }
 0x106   : > { %v882_v10 = vpop.eup %881  ;;  %905 = vtanh.f32 %v468_v19 }
 0x107   : > { %801 = vmatprep.subr.mxu1 %v882_v10  ;;  %907 = vtanh.f32 %v463_v22 }
 0x108   : > { %v884_v12 = vpop.eup %883  ;;  %802 = vmatpush3.msra.mxu1 %v882_v10  ;;  %909 = vtanh.f32 %v458_v25 }
 0x109   : > { %803 = vmatprep.subr.mxu1 %v884_v12  ;;  %v886_v15 = vpop.eup %885  ;;  %911 = vtanh.f32 %v453_v27 }
 0x10a   : > { %804 = vmatpush3.msra.mxu1 %v884_v12  ;;  %v888_v18 = vpop.eup %887 }
 0x10b   : > { %805 = vmatprep.subr.mxu1 %v886_v15  ;;  %v890_v20 = vpop.eup %889 }
 0x10c   : > { %806 = vmatpush3.msra.mxu1 %v886_v15  ;;  %v892_v23 = vpop.eup %891 }
 0x10d   : > { %807 = vmatprep.subr.mxu1 %v888_v18  ;;  %v894_v26 = vpop.eup %893 }
 0x10e   : > { %808 = vmatpush3.msra.mxu1 %v888_v18  ;;  %v896_v28 = vpop.eup %895 }
 0x10f   : > { %809 = vmatprep.subr.mxu1 %v890_v20  ;;  %v898_v29 = vpop.eup %897 }
 0x110   : > { %810 = vmatpush3.msra.mxu1 %v890_v20  ;;  %v900_v30 = vpop.eup %899 }
 0x111   : > { %811 = vmatprep.subr.mxu1 %v892_v23  ;;  %v902_v31 = vpop.eup %901 }
 0x112   : > { %812 = vmatpush3.msra.mxu1 %v892_v23  ;;  %v904_v32 = vpop.eup %903 }
 0x113   : > { %813 = vmatprep.subr.mxu1 %v894_v26  ;;  %v906_v33 = vpop.eup %905 }
 0x114   : > { %814 = vmatpush3.msra.mxu1 %v894_v26  ;;  %v908_v34 = vpop.eup %907 }
 0x115   : > { %815 = vmatprep.subr.mxu1 %v896_v28  ;;  %v910_v35 = vpop.eup %909 }
 0x116   : > { %816 = vmatpush3.msra.mxu1 %v896_v28  ;;  %v912_v36 = vpop.eup %911 }
 0x117   : > { %817 = vmatprep.subr.mxu1 %v898_v29 }
 0x118   : > { %818 = vmatpush3.msra.mxu1 %v898_v29 }
 0x119   : > { %819 = vmatprep.subr.mxu1 %v900_v30 }
 0x11a   : > { %820 = vmatpush3.msra.mxu1 %v900_v30 }
 0x11b   : > { %821 = vmatprep.subr.mxu1 %v902_v31 }
 0x11c   : > { %822 = vmatpush3.msra.mxu1 %v902_v31 }
 0x11d   : > { %823 = vmatprep.subr.mxu1 %v904_v32 }
 0x11e   : > { %824 = vmatpush3.msra.mxu1 %v904_v32 }
 0x11f   : > { %825 = vmatprep.subr.mxu1 %v906_v33 }
 0x120   : > { %826 = vmatpush3.msra.mxu1 %v906_v33 }
 0x121   : > { %827 = vmatprep.subr.mxu1 %v908_v34 }
 0x122   : > { %828 = vmatpush3.msra.mxu1 %v908_v34 }
 0x123   : > { %829 = vmatprep.subr.mxu1 %v910_v35 }
 0x124   : > { %830 = vmatpush3.msra.mxu1 %v910_v35 }
 0x125   : > { %831 = vmatprep.subr.mxu1 %v912_v36 }
 0x126   : > { %832 = vmatpush3.msra.mxu1 %v912_v36 }
 0x127   : > { %834 = vmatmul.mubr.f32.vlgmr.msra.gmra.mxu1 %v548_v37 }
 0x1e7   : > { %v835_v39 = vpop.f32.mrf.mxu1 }
 0x1e8   : > { %v633_v40 = vadd.f32 %v835_v39, %v559_v38 }
 0x1e9   : > { %v627_v42 = vpop.f32.mrf.mxu1 }
 0x1ea   : > { %637 = vst [vmem:[%s215_s26 + $0x8] sm:$0xff] %v633_v40  ;;  %v628_v43 = vadd.f32 %v627_v42, %v554_v41 }
 0x1ec   : > { %636 = vst [vmem:[%s215_s26] sm:$0xff] %v628_v43 }
 0x1ed   : > { %926 = shalt.err (!%p923_p3)
}
 0x1ee   : > { %s927_s14 = scalar_lea.hbm %s1203_s9, 256  ;;  %s931_s17 = scalar_lea.hbm %s1250_s5, 512 }
 0x1ef   : > { %p928_p4 = scmp.ne.s32.totalorder %s1203_s9, %s927_s14  ;;  %p932_p9 = scmp.lt.s32.totalorder %s1203_s9, %s1250_s5 }
 0x1f0   : > { %p933_p10 = scmp.lt.s32.totalorder %s931_s17, %s927_s14 }
 0x1f1   : > { %p929_p7 = pnand %p928_p4, %p1048_p5 }
 0x1f2   : > { %p934_p11 = por %p933_p10, %p932_p9 }
 0x1f3   : > { %p930_p8 = pneg %p929_p7 }
 0x1f5   : > { %p935_p12 = pnand %p934_p11, %p930_p8 }
 0x1f7   : > { %938 = shalt.err (!%p935_p12)
}
 0x1f8   : > { %s977_s26 = smov 128   ;;  %s978_s6 = smov 256  }
 0x1f9   : > { %s979_s7 = smov 8  }
 0x1fa   : > { %836 = dma.vmem_to_hbm [thread:$0]  (%p1048_p5), %s1198_s30, 256, %s1203_s9, %s1205_s10, %s977_s26, %s978_s6, %s979_s7  }
 0x1fb PF: > { %p842_p13 = scmp.ge.s32.totalorder %s973_s21, 2  ;;  %s666_s8 = sand.u32 1, %s961_s18  }
 0x1fc   : > { %s667_s22 = scalar_lea.sflag [#allocation3], %s666_s8 }
 0x1fd   : > { %p839_p0 = pnand %p842_p13, %p1052_p6 }
 0x1ff   : > { %p840_p1 = pneg %p839_p0 }
 0x201   : > { %956 = dma.done.wait (%p840_p1), %s667_s22, 256  }
 0x202   : > { %958 = vsyncadd (%p840_p1), %s667_s22, 4294967040  ;;  %p15_p2 = scmp.ge.s32.totalorder %s1035_s24, 4   ;;  %s1253_s18 = smov %s965_s19 }
 0x203   : > { %s1254_s19 = smov %s969_s20  ;;  %s1255_s20 = smov %s1046_s27 }
 0x204   : > { %s1256_s21 = smov %s1035_s24  ;;  %17 = sbr.rel (!%p15_p2) target bundleno = 3 (0x3), region = 75 }
 0x209   :  { %672 = vsyncpa [#allocation3], 1 }
 0x20a   :  { %674 = vsyncpa [#allocation3 + $0x1], 1 }

</bundles_post_ra>
